<compile_context>
chip_gen: v5e
topology: v5e:2x2
jax: 0.10.0
libtpu: 0.0.40
codegen_flags: <defaults>
</compile_context>

<pallas_src>
import functools

import jax
import jax.numpy as jnp
from jax.experimental import pallas as pl
from jax.experimental.pallas import tpu as pltpu


def _cross_attn2_kernel(y_ref, z_ref,
                        wq, bq, wk, bk, wv, bv, wp, bp,
                        o_ref, *, tb, n, c, num_heads, scale, compute_dtype):
    f32 = jnp.float32
    p = c // num_heads

    yb = y_ref[...]                                   # (tb*n, c)
    zb = z_ref[...]                                   # (tb*n, c)
    yc = yb.astype(compute_dtype)
    zc = zb.astype(compute_dtype)

    # --- q / k / v projections: one big matmul over all TB windows each ---
    q = jnp.dot(zc, wq[...].astype(compute_dtype), preferred_element_type=f32) + bq[...]
    k = jnp.dot(zc, wk[...].astype(compute_dtype), preferred_element_type=f32) + bk[...]
    v = jnp.dot(yc, wv[...].astype(compute_dtype), preferred_element_type=f32) + bv[...]
    q = q * scale

    # --- per-window attention: view as (tb, n, c), heads sliced on lanes ---
    q3 = q.reshape(tb, n, c)
    k3 = k.reshape(tb, n, c)
    v3 = v.reshape(tb, n, c)

    head_outs = []
    for h in range(num_heads):                        # static, small Nh
        lo = h * p
        qh = q3[:, :, lo:lo + p].astype(compute_dtype)
        kh = k3[:, :, lo:lo + p].astype(compute_dtype)
        vh = v3[:, :, lo:lo + p].astype(compute_dtype)
        s = jnp.einsum('bnp,bmp->bnm', qh, kh, preferred_element_type=f32)
        m = jnp.max(s, axis=-1, keepdims=True)
        e = jnp.exp(s - m)
        attn = e / (jnp.sum(e, axis=-1, keepdims=True) + 1.0)   # SoftmaxPlusOne
        # TODO(synk): attn_drop / proj_drop with p>0 would need pltpu.prng_*;
        # they are identity at the module's default rates (0.0).
        oh = jnp.einsum('bnm,bmp->bnp', attn.astype(compute_dtype), vh,
                        preferred_element_type=f32)
        head_outs.append(oh)

    o3 = jnp.concatenate(head_outs, axis=-1)          # (tb, n, c), head-major
    yres = yb.astype(f32) + o3.reshape(tb * n, c)     # residual: y + y1

    out = jnp.dot(yres.astype(compute_dtype), wp[...].astype(compute_dtype),
                  preferred_element_type=f32) + bp[...]
    o_ref[...] = out.astype(o_ref.dtype)


def _pick_tb(bn, n, c, dtype_bytes=4):
    """Windows per grid step: large enough to amortize per-step overhead,
    small enough that the double-buffered y/z/out blocks fit comfortably in
    scoped VMEM on all generations (v7x has only 64 MiB physical), and leaving
    >= 2 grid steps when possible so both v7x TensorCores get work."""
    lane_c = ((c + 127) // 128) * 128                 # lane padding
    per_window = n * lane_c * dtype_bytes             # one buffer, one array
    pipelined = 3 * 2 * per_window                    # y + z + out, double-buffered
    budget = 8 << 20                                  # well under scoped VMEM
    tb = max(1, budget // pipelined)
    tb = min(tb, bn)
    if bn >= 2:
        tb = min(tb, max(1, bn // 2))
    return int(tb)


def cross_attention2(inputs, params, num_heads, *, tb=None,
                     compute_dtype=jnp.float32):
    """inputs = (y, z, x), each (Bn, Mh, Mw, C). Returns (Bn, Mh, Mw, C)."""
    y, z, x = inputs[0], inputs[1], inputs[2]
    Bn, Mh, Mw, C = x.shape
    assert y.shape == x.shape and z.shape == x.shape
    assert C % num_heads == 0
    N = Mh * Mw
    P = C // num_heads
    scale = float(P) ** -0.5

    if tb is None:
        tb = _pick_tb(Bn, N, C)
    bn_pad = ((Bn + tb - 1) // tb) * tb               # pad batch to multiple of TB

    y2 = y.reshape(Bn, N, C)
    z2 = z.reshape(Bn, N, C)
    if bn_pad != Bn:
        pad = ((0, bn_pad - Bn), (0, 0), (0, 0))
        y2 = jnp.pad(y2, pad)
        z2 = jnp.pad(z2, pad)
    y2 = y2.reshape(bn_pad * N, C)
    z2 = z2.reshape(bn_pad * N, C)

    rows = tb * N
    grid = (bn_pad // tb,)

    wq, bq = params["wq"], params["bq"]
    wk, bk = params["wk"], params["bk"]
    wv, bv = params["wv"], params["bv"]
    wp, bp = params["wp"], params["bp"]

    def full(a):
        nd = a.ndim
        return pl.BlockSpec(a.shape, lambda i, _nd=nd: (0,) * _nd)

    kernel = functools.partial(
        _cross_attn2_kernel, tb=tb, n=N, c=C, num_heads=num_heads,
        scale=scale, compute_dtype=compute_dtype)

    out = pl.pallas_call(
        kernel,
        out_shape=jax.ShapeDtypeStruct((bn_pad * N, C), x.dtype),
        grid=grid,
        in_specs=[
            pl.BlockSpec((rows, C), lambda i: (i, 0)),   # y block: TB windows
            pl.BlockSpec((rows, C), lambda i: (i, 0)),   # z block: TB windows
            full(wq), full(bq), full(wk), full(bk),
            full(wv), full(bv), full(wp), full(bp),
        ],
        out_specs=pl.BlockSpec((rows, C), lambda i: (i, 0)),
        compiler_params=pltpu.CompilerParams(
            dimension_semantics=("parallel",)),
    )(y2, z2, wq, bq, wk, bk, wv, bv, wp, bp)

    out = out.reshape(bn_pad, N, C)[:Bn]
    return out.reshape(Bn, Mh, Mw, C)


def init_params(key, dim):
    """Synthetic params. Weights stored as (in, out) so the kernel computes
    t @ W + b (equivalent to torch Linear with W = weight.T)."""
    ks = jax.random.split(key, 8)
    mk = lambda k, shape: jax.random.normal(k, shape, jnp.float32) * 0.1
    return {
        "wq": mk(ks[0], (dim, dim)), "bq": mk(ks[1], (1, dim)),
        "wk": mk(ks[2], (dim, dim)), "bk": mk(ks[3], (1, dim)),
        "wv": mk(ks[4], (dim, dim)), "bv": mk(ks[5], (1, dim)),
        "wp": mk(ks[6], (dim, dim)), "bp": mk(ks[7], (1, dim)),
    }


def reference_forward(inputs, p, num_heads):
    """Plain-JAX reference mirroring the PyTorch forward (dropout = identity)."""
    y, z, x = inputs[0], inputs[1], inputs[2]
    Bn, Mh, Mw, C = x.shape
    N = Mh * Mw
    P = C // num_heads
    scale = float(P) ** -0.5
    y2 = y.reshape(Bn, N, C)
    z2 = z.reshape(Bn, N, C)
    q = z2 @ p["wq"] + p["bq"]
    k = z2 @ p["wk"] + p["bk"]
    v = y2 @ p["wv"] + p["bv"]

    def split(t):  # (Bn, N, C) -> (Bn, Nh, N, P), head-major channel split
        return t.reshape(Bn, N, num_heads, P).transpose(0, 2, 1, 3)

    qh, kh, vh = split(q) * scale, split(k), split(v)
    s = jnp.einsum('bhnp,bhmp->bhnm', qh, kh)
    m = s.max(-1, keepdims=True)
    e = jnp.exp(s - m)
    attn = e / (e.sum(-1, keepdims=True) + 1.0)       # SoftmaxPlusOne
    o = jnp.einsum('bhnm,bhmp->bhnp', attn, vh)       # (Bn, Nh, N, P)
    o = o.transpose(0, 2, 1, 3).reshape(Bn, N, C)     # concat heads, head-major
    yr = y2 + o
    out = yr @ p["wp"] + p["bp"]
    return out.reshape(Bn, Mh, Mw, C)


if __name__ == "__main__":
    # Small shapes consistent with the module: window of Mh*Mw tokens, C dims.
    Bn, Mh, Mw, C = 2, 4, 4, 32
    num_heads = 4

    key = jax.random.PRNGKey(0)
    ky, kz, kx, kp = jax.random.split(key, 4)
    y = jax.random.normal(ky, (Bn, Mh, Mw, C), jnp.float32)
    z = jax.random.normal(kz, (Bn, Mh, Mw, C), jnp.float32)
    x = jax.random.normal(kx, (Bn, Mh, Mw, C), jnp.float32)
    params = init_params(kp, C)

    inputs = (y, z, x)
    out = cross_attention2(inputs, params, num_heads)
    out = jax.block_until_ready(out)

    ref = reference_forward(inputs, params, num_heads)
    assert out.shape == (Bn, Mh, Mw, C)
    assert jnp.allclose(out, ref, atol=1e-4, rtol=1e-4), "mismatch vs reference"

    print("KERNEL_OK")
</pallas_src>

<mosaic_0001>
module attributes {stable_mosaic.version = 11 : i64} {
  func.func @_cross_attn2_kernel(%arg0: i32, %arg1: memref<16x32xf32, #tpu.memory_space<vmem>>, %arg2: memref<16x32xf32, #tpu.memory_space<vmem>>, %arg3: memref<32x32xf32, #tpu.memory_space<vmem>>, %arg4: memref<1x32xf32, #tpu.memory_space<vmem>>, %arg5: memref<32x32xf32, #tpu.memory_space<vmem>>, %arg6: memref<1x32xf32, #tpu.memory_space<vmem>>, %arg7: memref<32x32xf32, #tpu.memory_space<vmem>>, %arg8: memref<1x32xf32, #tpu.memory_space<vmem>>, %arg9: memref<32x32xf32, #tpu.memory_space<vmem>>, %arg10: memref<1x32xf32, #tpu.memory_space<vmem>>, %arg11: memref<16x32xf32, #tpu.memory_space<vmem>>) attributes {dimension_semantics = [#tpu.dimension_semantics<parallel>], iteration_bounds = array<i64: 2>, scalar_prefetch = 0 : i64, scratch_operands = 0 : i64, tpu.core_type = #tpu.core_type<tc>, window_params = [{transform_indices = @transform_0, window_bounds = array<i64: 16, 32>}, {transform_indices = @transform_1, window_bounds = array<i64: 16, 32>}, {pipeline_mode = #tpu.pipeline_mode<synchronous>, transform_indices = @transform_2, window_bounds = array<i64: 32, 32>}, {pipeline_mode = #tpu.pipeline_mode<synchronous>, transform_indices = @transform_3, window_bounds = array<i64: 1, 32>}, {pipeline_mode = #tpu.pipeline_mode<synchronous>, transform_indices = @transform_4, window_bounds = array<i64: 32, 32>}, {pipeline_mode = #tpu.pipeline_mode<synchronous>, transform_indices = @transform_5, window_bounds = array<i64: 1, 32>}, {pipeline_mode = #tpu.pipeline_mode<synchronous>, transform_indices = @transform_6, window_bounds = array<i64: 32, 32>}, {pipeline_mode = #tpu.pipeline_mode<synchronous>, transform_indices = @transform_7, window_bounds = array<i64: 1, 32>}, {pipeline_mode = #tpu.pipeline_mode<synchronous>, transform_indices = @transform_8, window_bounds = array<i64: 32, 32>}, {pipeline_mode = #tpu.pipeline_mode<synchronous>, transform_indices = @transform_9, window_bounds = array<i64: 1, 32>}, {transform_indices = @transform_10, window_bounds = array<i64: 16, 32>}]} {
    %c0 = arith.constant 0 : index
    %c0_0 = arith.constant 0 : index
    %0 = vector.load %arg1[%c0, %c0_0] : memref<16x32xf32, #tpu.memory_space<vmem>>, vector<16x32xf32>
    %c0_1 = arith.constant 0 : index
    %c0_2 = arith.constant 0 : index
    %1 = vector.load %arg2[%c0_1, %c0_2] : memref<16x32xf32, #tpu.memory_space<vmem>>, vector<16x32xf32>
    %c0_3 = arith.constant 0 : index
    %c0_4 = arith.constant 0 : index
    %2 = vector.load %arg3[%c0_3, %c0_4] : memref<32x32xf32, #tpu.memory_space<vmem>>, vector<32x32xf32>
    %cst = arith.constant dense<0.000000e+00> : vector<16x32xf32>
    %3 = tpu.matmul %1, %2, %cst {dimension_numbers = #tpu.dot_dimension_numbers<[1], [0], [0], [1], [0, 0, 1, 1], [], []>} : vector<16x32xf32>, vector<32x32xf32>, vector<16x32xf32> -> vector<16x32xf32>
    %c0_5 = arith.constant 0 : index
    %c0_6 = arith.constant 0 : index
    %4 = vector.load %arg4[%c0_5, %c0_6] : memref<1x32xf32, #tpu.memory_space<vmem>>, vector<1x32xf32>
    %5 = vector.broadcast %4 : vector<1x32xf32> to vector<16x32xf32>
    %6 = arith.addf %3, %5 : vector<16x32xf32>
    %c0_7 = arith.constant 0 : index
    %c0_8 = arith.constant 0 : index
    %7 = vector.load %arg5[%c0_7, %c0_8] : memref<32x32xf32, #tpu.memory_space<vmem>>, vector<32x32xf32>
    %cst_9 = arith.constant dense<0.000000e+00> : vector<16x32xf32>
    %8 = tpu.matmul %1, %7, %cst_9 {dimension_numbers = #tpu.dot_dimension_numbers<[1], [0], [0], [1], [0, 0, 1, 1], [], []>} : vector<16x32xf32>, vector<32x32xf32>, vector<16x32xf32> -> vector<16x32xf32>
    %c0_10 = arith.constant 0 : index
    %c0_11 = arith.constant 0 : index
    %9 = vector.load %arg6[%c0_10, %c0_11] : memref<1x32xf32, #tpu.memory_space<vmem>>, vector<1x32xf32>
    %10 = vector.broadcast %9 : vector<1x32xf32> to vector<16x32xf32>
    %11 = arith.addf %8, %10 : vector<16x32xf32>
    %c0_12 = arith.constant 0 : index
    %c0_13 = arith.constant 0 : index
    %12 = vector.load %arg7[%c0_12, %c0_13] : memref<32x32xf32, #tpu.memory_space<vmem>>, vector<32x32xf32>
    %cst_14 = arith.constant dense<0.000000e+00> : vector<16x32xf32>
    %13 = tpu.matmul %0, %12, %cst_14 {dimension_numbers = #tpu.dot_dimension_numbers<[1], [0], [0], [1], [0, 0, 1, 1], [], []>} : vector<16x32xf32>, vector<32x32xf32>, vector<16x32xf32> -> vector<16x32xf32>
    %c0_15 = arith.constant 0 : index
    %c0_16 = arith.constant 0 : index
    %14 = vector.load %arg8[%c0_15, %c0_16] : memref<1x32xf32, #tpu.memory_space<vmem>>, vector<1x32xf32>
    %15 = vector.broadcast %14 : vector<1x32xf32> to vector<16x32xf32>
    %16 = arith.addf %13, %15 : vector<16x32xf32>
    %cst_17 = arith.constant 0.353553385 : f32
    %17 = vector.broadcast %cst_17 : f32 to vector<16x32xf32>
    %18 = arith.mulf %6, %17 : vector<16x32xf32>
    %19 = vector.shape_cast %18 : vector<16x32xf32> to vector<1x16x32xf32>
    %20 = vector.shape_cast %11 : vector<16x32xf32> to vector<1x16x32xf32>
    %21 = vector.shape_cast %16 : vector<16x32xf32> to vector<1x16x32xf32>
    %22 = vector.extract_strided_slice %19 {offsets = [0, 0, 0], sizes = [1, 16, 8], strides = [1, 1, 1]} : vector<1x16x32xf32> to vector<1x16x8xf32>
    %23 = vector.extract_strided_slice %20 {offsets = [0, 0, 0], sizes = [1, 16, 8], strides = [1, 1, 1]} : vector<1x16x32xf32> to vector<1x16x8xf32>
    %24 = vector.extract_strided_slice %21 {offsets = [0, 0, 0], sizes = [1, 16, 8], strides = [1, 1, 1]} : vector<1x16x32xf32> to vector<1x16x8xf32>
    "tpu.trace_start"() <{level = 10 : i32, message = "bnp,bmp->bnm"}> : () -> ()
    %cst_18 = arith.constant dense<0.000000e+00> : vector<1x16x16xf32>
    %25 = tpu.matmul %22, %23, %cst_18 {dimension_numbers = #tpu.dot_dimension_numbers<[2], [2], [1], [1], [0, 0, 0, 1, 1, 1], [0], [0]>} : vector<1x16x8xf32>, vector<1x16x8xf32>, vector<1x16x16xf32> -> vector<1x16x16xf32>
    "tpu.trace_stop"() : () -> ()
    %cst_19 = arith.constant dense<0xFF800000> : vector<1x16xf32>
    %26 = vector.multi_reduction <maximumf>, %25, %cst_19 [2] : vector<1x16x16xf32> to vector<1x16xf32>
    %27 = vector.shape_cast %26 : vector<1x16xf32> to vector<1x16x1xf32>
    %28 = vector.broadcast %27 : vector<1x16x1xf32> to vector<1x16x16xf32>
    %29 = arith.subf %25, %28 : vector<1x16x16xf32>
    %30 = math.exp %29 : vector<1x16x16xf32>
    %cst_20 = arith.constant dense<0.000000e+00> : vector<1x16xf32>
    %31 = vector.multi_reduction <add>, %30, %cst_20 [2] : vector<1x16x16xf32> to vector<1x16xf32>
    %32 = vector.shape_cast %31 : vector<1x16xf32> to vector<1x16x1xf32>
    %cst_21 = arith.constant 1.000000e+00 : f32
    %33 = vector.broadcast %cst_21 : f32 to vector<1x16x1xf32>
    %34 = arith.addf %32, %33 : vector<1x16x1xf32>
    %35 = vector.broadcast %34 : vector<1x16x1xf32> to vector<1x16x16xf32>
    %36 = arith.divf %30, %35 : vector<1x16x16xf32>
    "tpu.trace_start"() <{level = 10 : i32, message = "bnm,bmp->bnp"}> : () -> ()
    %cst_22 = arith.constant dense<0.000000e+00> : vector<1x16x8xf32>
    %37 = tpu.matmul %36, %24, %cst_22 {dimension_numbers = #tpu.dot_dimension_numbers<[2], [1], [1], [2], [0, 0, 0, 1, 1, 2], [0], [0]>} : vector<1x16x16xf32>, vector<1x16x8xf32>, vector<1x16x8xf32> -> vector<1x16x8xf32>
    "tpu.trace_stop"() : () -> ()
    %38 = vector.extract_strided_slice %19 {offsets = [0, 0, 8], sizes = [1, 16, 8], strides = [1, 1, 1]} : vector<1x16x32xf32> to vector<1x16x8xf32>
    %39 = vector.extract_strided_slice %20 {offsets = [0, 0, 8], sizes = [1, 16, 8], strides = [1, 1, 1]} : vector<1x16x32xf32> to vector<1x16x8xf32>
    %40 = vector.extract_strided_slice %21 {offsets = [0, 0, 8], sizes = [1, 16, 8], strides = [1, 1, 1]} : vector<1x16x32xf32> to vector<1x16x8xf32>
    "tpu.trace_start"() <{level = 10 : i32, message = "bnp,bmp->bnm"}> : () -> ()
    %cst_23 = arith.constant dense<0.000000e+00> : vector<1x16x16xf32>
    %41 = tpu.matmul %38, %39, %cst_23 {dimension_numbers = #tpu.dot_dimension_numbers<[2], [2], [1], [1], [0, 0, 0, 1, 1, 1], [0], [0]>} : vector<1x16x8xf32>, vector<1x16x8xf32>, vector<1x16x16xf32> -> vector<1x16x16xf32>
    "tpu.trace_stop"() : () -> ()
    %cst_24 = arith.constant dense<0xFF800000> : vector<1x16xf32>
    %42 = vector.multi_reduction <maximumf>, %41, %cst_24 [2] : vector<1x16x16xf32> to vector<1x16xf32>
    %43 = vector.shape_cast %42 : vector<1x16xf32> to vector<1x16x1xf32>
    %44 = vector.broadcast %43 : vector<1x16x1xf32> to vector<1x16x16xf32>
    %45 = arith.subf %41, %44 : vector<1x16x16xf32>
    %46 = math.exp %45 : vector<1x16x16xf32>
    %cst_25 = arith.constant dense<0.000000e+00> : vector<1x16xf32>
    %47 = vector.multi_reduction <add>, %46, %cst_25 [2] : vector<1x16x16xf32> to vector<1x16xf32>
    %48 = vector.shape_cast %47 : vector<1x16xf32> to vector<1x16x1xf32>
    %cst_26 = arith.constant 1.000000e+00 : f32
    %49 = vector.broadcast %cst_26 : f32 to vector<1x16x1xf32>
    %50 = arith.addf %48, %49 : vector<1x16x1xf32>
    %51 = vector.broadcast %50 : vector<1x16x1xf32> to vector<1x16x16xf32>
    %52 = arith.divf %46, %51 : vector<1x16x16xf32>
    "tpu.trace_start"() <{level = 10 : i32, message = "bnm,bmp->bnp"}> : () -> ()
    %cst_27 = arith.constant dense<0.000000e+00> : vector<1x16x8xf32>
    %53 = tpu.matmul %52, %40, %cst_27 {dimension_numbers = #tpu.dot_dimension_numbers<[2], [1], [1], [2], [0, 0, 0, 1, 1, 2], [0], [0]>} : vector<1x16x16xf32>, vector<1x16x8xf32>, vector<1x16x8xf32> -> vector<1x16x8xf32>
    "tpu.trace_stop"() : () -> ()
    %54 = vector.extract_strided_slice %19 {offsets = [0, 0, 16], sizes = [1, 16, 8], strides = [1, 1, 1]} : vector<1x16x32xf32> to vector<1x16x8xf32>
    %55 = vector.extract_strided_slice %20 {offsets = [0, 0, 16], sizes = [1, 16, 8], strides = [1, 1, 1]} : vector<1x16x32xf32> to vector<1x16x8xf32>
    %56 = vector.extract_strided_slice %21 {offsets = [0, 0, 16], sizes = [1, 16, 8], strides = [1, 1, 1]} : vector<1x16x32xf32> to vector<1x16x8xf32>
    "tpu.trace_start"() <{level = 10 : i32, message = "bnp,bmp->bnm"}> : () -> ()
    %cst_28 = arith.constant dense<0.000000e+00> : vector<1x16x16xf32>
    %57 = tpu.matmul %54, %55, %cst_28 {dimension_numbers = #tpu.dot_dimension_numbers<[2], [2], [1], [1], [0, 0, 0, 1, 1, 1], [0], [0]>} : vector<1x16x8xf32>, vector<1x16x8xf32>, vector<1x16x16xf32> -> vector<1x16x16xf32>
    "tpu.trace_stop"() : () -> ()
    %cst_29 = arith.constant dense<0xFF800000> : vector<1x16xf32>
    %58 = vector.multi_reduction <maximumf>, %57, %cst_29 [2] : vector<1x16x16xf32> to vector<1x16xf32>
    %59 = vector.shape_cast %58 : vector<1x16xf32> to vector<1x16x1xf32>
    %60 = vector.broadcast %59 : vector<1x16x1xf32> to vector<1x16x16xf32>
    %61 = arith.subf %57, %60 : vector<1x16x16xf32>
    %62 = math.exp %61 : vector<1x16x16xf32>
    %cst_30 = arith.constant dense<0.000000e+00> : vector<1x16xf32>
    %63 = vector.multi_reduction <add>, %62, %cst_30 [2] : vector<1x16x16xf32> to vector<1x16xf32>
    %64 = vector.shape_cast %63 : vector<1x16xf32> to vector<1x16x1xf32>
    %cst_31 = arith.constant 1.000000e+00 : f32
    %65 = vector.broadcast %cst_31 : f32 to vector<1x16x1xf32>
    %66 = arith.addf %64, %65 : vector<1x16x1xf32>
    %67 = vector.broadcast %66 : vector<1x16x1xf32> to vector<1x16x16xf32>
    %68 = arith.divf %62, %67 : vector<1x16x16xf32>
    "tpu.trace_start"() <{level = 10 : i32, message = "bnm,bmp->bnp"}> : () -> ()
    %cst_32 = arith.constant dense<0.000000e+00> : vector<1x16x8xf32>
    %69 = tpu.matmul %68, %56, %cst_32 {dimension_numbers = #tpu.dot_dimension_numbers<[2], [1], [1], [2], [0, 0, 0, 1, 1, 2], [0], [0]>} : vector<1x16x16xf32>, vector<1x16x8xf32>, vector<1x16x8xf32> -> vector<1x16x8xf32>
    "tpu.trace_stop"() : () -> ()
    %70 = vector.extract_strided_slice %19 {offsets = [0, 0, 24], sizes = [1, 16, 8], strides = [1, 1, 1]} : vector<1x16x32xf32> to vector<1x16x8xf32>
    %71 = vector.extract_strided_slice %20 {offsets = [0, 0, 24], sizes = [1, 16, 8], strides = [1, 1, 1]} : vector<1x16x32xf32> to vector<1x16x8xf32>
    %72 = vector.extract_strided_slice %21 {offsets = [0, 0, 24], sizes = [1, 16, 8], strides = [1, 1, 1]} : vector<1x16x32xf32> to vector<1x16x8xf32>
    "tpu.trace_start"() <{level = 10 : i32, message = "bnp,bmp->bnm"}> : () -> ()
    %cst_33 = arith.constant dense<0.000000e+00> : vector<1x16x16xf32>
    %73 = tpu.matmul %70, %71, %cst_33 {dimension_numbers = #tpu.dot_dimension_numbers<[2], [2], [1], [1], [0, 0, 0, 1, 1, 1], [0], [0]>} : vector<1x16x8xf32>, vector<1x16x8xf32>, vector<1x16x16xf32> -> vector<1x16x16xf32>
    "tpu.trace_stop"() : () -> ()
    %cst_34 = arith.constant dense<0xFF800000> : vector<1x16xf32>
    %74 = vector.multi_reduction <maximumf>, %73, %cst_34 [2] : vector<1x16x16xf32> to vector<1x16xf32>
    %75 = vector.shape_cast %74 : vector<1x16xf32> to vector<1x16x1xf32>
    %76 = vector.broadcast %75 : vector<1x16x1xf32> to vector<1x16x16xf32>
    %77 = arith.subf %73, %76 : vector<1x16x16xf32>
    %78 = math.exp %77 : vector<1x16x16xf32>
    %cst_35 = arith.constant dense<0.000000e+00> : vector<1x16xf32>
    %79 = vector.multi_reduction <add>, %78, %cst_35 [2] : vector<1x16x16xf32> to vector<1x16xf32>
    %80 = vector.shape_cast %79 : vector<1x16xf32> to vector<1x16x1xf32>
    %cst_36 = arith.constant 1.000000e+00 : f32
    %81 = vector.broadcast %cst_36 : f32 to vector<1x16x1xf32>
    %82 = arith.addf %80, %81 : vector<1x16x1xf32>
    %83 = vector.broadcast %82 : vector<1x16x1xf32> to vector<1x16x16xf32>
    %84 = arith.divf %78, %83 : vector<1x16x16xf32>
    "tpu.trace_start"() <{level = 10 : i32, message = "bnm,bmp->bnp"}> : () -> ()
    %cst_37 = arith.constant dense<0.000000e+00> : vector<1x16x8xf32>
    %85 = tpu.matmul %84, %72, %cst_37 {dimension_numbers = #tpu.dot_dimension_numbers<[2], [1], [1], [2], [0, 0, 0, 1, 1, 2], [0], [0]>} : vector<1x16x16xf32>, vector<1x16x8xf32>, vector<1x16x8xf32> -> vector<1x16x8xf32>
    "tpu.trace_stop"() : () -> ()
    %86 = tpu.concatenate %37, %53, %69, %85 in 2 : vector<1x16x8xf32>, vector<1x16x8xf32>, vector<1x16x8xf32>, vector<1x16x8xf32> -> vector<1x16x32xf32>
    %87 = vector.shape_cast %86 : vector<1x16x32xf32> to vector<16x32xf32>
    %88 = arith.addf %0, %87 : vector<16x32xf32>
    %c0_38 = arith.constant 0 : index
    %c0_39 = arith.constant 0 : index
    %89 = vector.load %arg9[%c0_38, %c0_39] : memref<32x32xf32, #tpu.memory_space<vmem>>, vector<32x32xf32>
    %cst_40 = arith.constant dense<0.000000e+00> : vector<16x32xf32>
    %90 = tpu.matmul %88, %89, %cst_40 {dimension_numbers = #tpu.dot_dimension_numbers<[1], [0], [0], [1], [0, 0, 1, 1], [], []>} : vector<16x32xf32>, vector<32x32xf32>, vector<16x32xf32> -> vector<16x32xf32>
    %c0_41 = arith.constant 0 : index
    %c0_42 = arith.constant 0 : index
    %91 = vector.load %arg10[%c0_41, %c0_42] : memref<1x32xf32, #tpu.memory_space<vmem>>, vector<1x32xf32>
    %92 = vector.broadcast %91 : vector<1x32xf32> to vector<16x32xf32>
    %93 = arith.addf %90, %92 : vector<16x32xf32>
    %c0_43 = arith.constant 0 : index
    %c0_44 = arith.constant 0 : index
    %94 = vector.load %arg11[%c0_43, %c0_44] : memref<16x32xf32, #tpu.memory_space<vmem>>, vector<16x32xf32>
    tpu.vector_store %arg11[%c0_43, %c0_44], %93 {strides = array<i32>} : memref<16x32xf32, #tpu.memory_space<vmem>>, vector<16x32xf32>,
    return
  }
  func.func @transform_0(%arg0: i32) -> (i32, i32) {
    %c0_i32 = arith.constant 0 : i32
    %c0_i32_0 = arith.constant 0 : i32
    return %arg0, %c0_i32 : i32, i32
  }
  func.func @transform_1(%arg0: i32) -> (i32, i32) {
    %c0_i32 = arith.constant 0 : i32
    %c0_i32_0 = arith.constant 0 : i32
    return %arg0, %c0_i32 : i32, i32
  }
  func.func @transform_2(%arg0: i32) -> (i32, i32) {
    %c0_i32 = arith.constant 0 : i32
    %c0_i32_0 = arith.constant 0 : i32
    %c0_i32_1 = arith.constant 0 : i32
    return %c0_i32, %c0_i32_0 : i32, i32
  }
  func.func @transform_3(%arg0: i32) -> (i32, i32) {
    %c0_i32 = arith.constant 0 : i32
    %c0_i32_0 = arith.constant 0 : i32
    %c0_i32_1 = arith.constant 0 : i32
    return %c0_i32, %c0_i32_0 : i32, i32
  }
  func.func @transform_4(%arg0: i32) -> (i32, i32) {
    %c0_i32 = arith.constant 0 : i32
    %c0_i32_0 = arith.constant 0 : i32
    %c0_i32_1 = arith.constant 0 : i32
    return %c0_i32, %c0_i32_0 : i32, i32
  }
  func.func @transform_5(%arg0: i32) -> (i32, i32) {
    %c0_i32 = arith.constant 0 : i32
    %c0_i32_0 = arith.constant 0 : i32
    %c0_i32_1 = arith.constant 0 : i32
    return %c0_i32, %c0_i32_0 : i32, i32
  }
  func.func @transform_6(%arg0: i32) -> (i32, i32) {
    %c0_i32 = arith.constant 0 : i32
    %c0_i32_0 = arith.constant 0 : i32
    %c0_i32_1 = arith.constant 0 : i32
    return %c0_i32, %c0_i32_0 : i32, i32
  }
  func.func @transform_7(%arg0: i32) -> (i32, i32) {
    %c0_i32 = arith.constant 0 : i32
    %c0_i32_0 = arith.constant 0 : i32
    %c0_i32_1 = arith.constant 0 : i32
    return %c0_i32, %c0_i32_0 : i32, i32
  }
  func.func @transform_8(%arg0: i32) -> (i32, i32) {
    %c0_i32 = arith.constant 0 : i32
    %c0_i32_0 = arith.constant 0 : i32
    %c0_i32_1 = arith.constant 0 : i32
    return %c0_i32, %c0_i32_0 : i32, i32
  }
  func.func @transform_9(%arg0: i32) -> (i32, i32) {
    %c0_i32 = arith.constant 0 : i32
    %c0_i32_0 = arith.constant 0 : i32
    %c0_i32_1 = arith.constant 0 : i32
    return %c0_i32, %c0_i32_0 : i32, i32
  }
  func.func @transform_10(%arg0: i32) -> (i32, i32) {
    %c0_i32 = arith.constant 0 : i32
    %c0_i32_0 = arith.constant 0 : i32
    return %arg0, %c0_i32 : i32, i32
  }
}

</mosaic_0001>

<bundles_post_ra>
// kernel: tpu_custom_call.1
= control target key start
LH: loop header
LB: loop body
LE: loop exit
PB: predicated region body
PF: predicated region fallthrough
CT: control target
= control target key end

     0   :  { %s2261_s0 = inlined_call_operand.hbm [shape: f32[32,32], index: 0, kind: input, shape index: {}]   ;;  %s2262_s1 = inlined_call_operand.hbm [shape: f32[32,32], index: 1, kind: input, shape index: {}]   ;;  %s2263_s2 = inlined_call_operand.hbm [shape: f32[32,32], index: 2, kind: input, shape index: {}]   ;;  %s2264_s3 = inlined_call_operand.vmem [shape: f32[1,32], index: 3, kind: input, shape index: {}]   ;;  %s2265_s4 = inlined_call_operand.hbm [shape: f32[32,32], index: 4, kind: input, shape index: {}]   ;;  %s2266_s5 = inlined_call_operand.vmem [shape: f32[1,32], index: 5, kind: input, shape index: {}]   ;;  %s2267_s6 = inlined_call_operand.hbm [shape: f32[32,32], index: 6, kind: input, shape index: {}]   ;;  %s2268_s7 = inlined_call_operand.vmem [shape: f32[1,32], index: 7, kind: input, shape index: {}]   ;;  %s2269_s8 = inlined_call_operand.hbm [shape: f32[32,32], index: 8, kind: input, shape index: {}]   ;;  %s2270_s9 = inlined_call_operand.vmem [shape: f32[1,32], index: 9, kind: input, shape index: {}]   ;;  %s2271_s10 = inlined_call_operand.hbm [shape: f32[32,32], index: 10, kind: output, shape index: {}]  }
   0x1   :  { %2280 = sst [smem:[#allocation24_spill]] %s2261_s0 }
   0x2   :  { %2281 = sst [smem:[#allocation25_spill]] %s2263_s2 }
   0x3   :  { %2282 = sst [smem:[#allocation26_spill]] %s2265_s4 }
   0x4   :  { %2283 = sst [smem:[#allocation27_spill]] %s2267_s6 }
   0x5   :  { %2284 = sst [smem:[#allocation28_spill]] %s2269_s8 }
   0x6   :  { %15 = vsyncpa [#allocation3], 0 }
   0x7   :  { %17 = vsyncpa [#allocation3 + $0x1], 0 }
   0x8   :  { %18 = vsyncpa [#allocation6], 0 }
   0x9   :  { %20 = vsyncpa [#allocation6 + $0x1], 0 }
   0xa   :  { %21 = vsyncpa [#allocation9], 0 }
   0xb   :  { %22 = vsyncpa [#allocation12], 0 }
   0xc   :  { %23 = vsyncpa [#allocation4], 0 }
   0xd   :  { %25 = vsyncpa [#allocation4 + $0x1], 0  ;;  %s1860_s13 = smov 0   ;;  %s1862_s14 = smov 0  }
   0xe   :  { %s1864_s15 = smov 0   ;;  %s1866_s16 = smov 0  }
   0xf LB: > { %2285 = sst [smem:[#allocation20_spill]] %s1786_s15  ;;  %s1881_s17 = sadd.s32 4294967295, %s1790_s16   ;;  %s1790_s16 = sphi %s1866_s16, %s2304_s16   ;;  %s1786_s15 = sphi %s1864_s15, %s2306_s15   ;;  %s1782_s14 = sphi %s1862_s14, %s2308_s14   ;;  %s1778_s13 = sphi %s1860_s13, %s2307_s13  }
  0x10   : > { %s1315_s18 = sadd.s32 4294967294, %s1790_s16   ;;  %p51_p0 = scmp.ne.s32.totalorder %s1782_s14, %s1778_s13 }
  0x11   : > { %p52_p1 = scmp.eq.s32.totalorder %s1881_s17, 0  ;;  %p269_p2 = scmp.eq.s32.totalorder %s1881_s17, 1 }
  0x12   : > { %p275_p3 = scmp.eq.s32.totalorder %s1315_s18, 1  ;;  %p1316_p5 = scmp.ge.s32.totalorder %s1790_s16, 1 }
  0x13   : > { %p1890_p4 = por %p52_p1, %p51_p0  ;;  %p282_p7 = scmp.lt.s32.totalorder %s1790_s16, 3 }
  0x14   : > { %p1895_p6 = por %p275_p3, %p51_p0  ;;  %s2289_s2 = sld [smem:[#allocation25_spill]] }
  0x15   : > { %p1903_p8 = pnand %p1316_p5, %p282_p7  ;;  %s1792_s25 = smov [#allocation7]  }
  0x16   : > { %s2287_s20 = scalar_select %p1895_p6, 1, 0 }
  0x17   : > { %p1398_p9 = pneg %p1903_p8  ;;  %s295_s26 = sshll.u32 %s1792_s25, 4  ;;  %s296_s26 = int_to_ptr.vmem [resolvable:$true] %s295_s26 }
  0x18   : > { %2288 = sst [smem:[#allocation21_spill]] %s2287_s20  ;;  %s2272_s11 = smov 128  }
  0x19   : > { %p1911_p10 = pnand %p1398_p9, %p52_p1  ;;  %s2292_s4 = sld [smem:[#allocation26_spill]] }
  0x1a   : > { %s293_s23 = sshll.u32 %s2289_s2, 4  ;;  %s2274_s12 = smov 8   ;;  %s294_s23 = int_to_ptr.hbm [resolvable:$true] %s293_s23 }
  0x1b   : > { %1401 = dma.hbm_to_vmem [thread:$0]  (!%p1911_p10), %s294_s23, 512, %s296_s26, [#allocation6], %s2272_s11, %s2272_s11, %s2274_s12  }
  0x1c   : > { %s1795_s18 = smov [#allocation8]   ;;  %s2293_s6 = sld [smem:[#allocation27_spill]] }
  0x1d   : > { %s312_s21 = sshll.u32 %s1795_s18, 4  ;;  %s2294_s8 = sld [smem:[#allocation28_spill]]  ;;  %s313_s21 = int_to_ptr.vmem [resolvable:$true] %s312_s21 }
  0x1e   : > { %s1796_s29 = smov [#allocation10]   ;;  %s1797_s22 = smov [#allocation11]  }
  0x1f   : > { %s310_s30 = sshll.u32 %s2292_s4, 4  ;;  %s329_s18 = sshll.u32 %s1796_s29, 4  ;;  %s311_s30 = int_to_ptr.hbm [resolvable:$true] %s310_s30  ;;  %s330_s18 = int_to_ptr.vmem [resolvable:$true] %s329_s18 }
  0x20   : > { %1404 = dma.hbm_to_vmem [thread:$0]  (!%p1911_p10), %s311_s30, 512, %s313_s21, [#allocation9], %s2272_s11, %s2272_s11, %s2274_s12  }
  0x21   : > { %s346_s30 = sshll.u32 %s1797_s22, 4  ;;  %s1946_s21 = sadd.s32 1, %s1790_s16   ;;  %s347_s30 = int_to_ptr.vmem [resolvable:$true] %s346_s30 }
  0x22   : > { %s327_s2 = sshll.u32 %s2293_s6, 4  ;;  %2295 = sst [smem:[#allocation22_spill]] %s1946_s21  ;;  %s328_s2 = int_to_ptr.hbm [resolvable:$true] %s327_s2 }
  0x23   : > { %s344_s28 = sshll.u32 %s2294_s8, 4  ;;  %s38_s25 = sadd.s32 1, %s1786_s15  ;;  %s345_s28 = int_to_ptr.hbm [resolvable:$true] %s344_s28 }
  0x24   : > { %1407 = dma.hbm_to_vmem [thread:$0]  (!%p1911_p10), %s328_s2, 512, %s330_s18, [#allocation9], %s2272_s11, %s2272_s11, %s2274_s12  }
  0x25   : > { %1410 = dma.hbm_to_vmem [thread:$0]  (!%p1911_p10), %s345_s28, 512, %s347_s30, [#allocation12], %s2272_s11, %s2272_s11, %s2274_s12  }
  0x26   : > { %s35_s23 = ssub.s32 %s1790_s16, %s1946_s21  ;;  %p45_p12 = scmp.ne.s32.totalorder %s1786_s15, %s1782_s14 }
  0x27   : > { %p36_p13 = scmp.eq.s32.totalorder %s35_s23, 0  ;;  %p46_p0 = scmp.eq.s32.totalorder %s1790_s16, 0 }
  0x28   : > { %p1956_p3 = por %p269_p2, %p45_p12  ;;  %p1426_p5 = scmp.lt.s32.totalorder %s1790_s16, 2 }
  0x29   : > { %s1962_s26 = scalar_select %p36_p13, %s1786_s15, %s38_s25  }
  0x2a   : > { %p47_p7 = por %p46_p0, %p45_p12  ;;  %s363_s27 = sand.u32 1, %s1786_s15  }
  0x2b   : > { %2297 = sst [smem:[#allocation23_spill]] %s1962_s26  ;;  %s1965_s29 = sshll.u32 %s363_s27, 4 }
  0x2c   : > { %s1373_s28 = sshll.u32 %s1790_s16, 4  ;;  %s2298_s0 = sld [smem:[#allocation24_spill]] }
  0x2d   : > { %s367_s23 = scalar_lea.vmem [#allocation2], %s1965_s29  ;;  %p1972_p2 = pnand %p1426_p5, %p47_p7 }
  0x2e   : > { %s375_s11 = sshll.u32 %s367_s23, 4  ;;  %s394_s8 = scalar_lea.hbm %s2262_s1, %s1373_s28  ;;  %s376_s11 = int_to_ptr.vmem [resolvable:$true] %s375_s11 }
  0x2f   : > { %s395_s26 = sshll.u32 %s394_s8, 4  ;;  %s364_s15 = scalar_lea.sflag [#allocation3], %s363_s27  ;;  %s396_s26 = int_to_ptr.hbm [resolvable:$true] %s395_s26 }
  0x30   : > { %p1652_p10 = pneg %p1972_p2 }
  0x32   : > { %s372_s30 = scalar_lea.hbm %s2298_s0, %s1373_s28  ;;  %s1655_s23 = scalar_lea.hbm %s2298_s0, 32 }
  0x33   : > { %s373_s12 = sshll.u32 %s372_s30, 4  ;;  %s374_s12 = int_to_ptr.hbm [resolvable:$true] %s373_s12 }
  0x34   : > { %s1648_s21 = sshra.s32 %s374_s12, 4  ;;  %s1649_s21 = int_to_ptr.hbm [resolvable:$true] %s1648_s21 }
  0x35   : > { %s1650_s18 = scalar_lea.hbm %s1649_s21, 16  ;;  %p1656_p0 = scmp.lt.s32.totalorder %s1649_s21, %s2298_s0 }
  0x36   : > { %p1651_p9 = scmp.ne.s32.totalorder %s1649_s21, %s1650_s18  ;;  %p1657_p5 = scmp.lt.s32.totalorder %s1655_s23, %s1650_s18 }
  0x38   : > { %p1653_p12 = pnand %p1652_p10, %p1651_p9  ;;  %p1658_p7 = por %p1657_p5, %p1656_p0 }
  0x3a   : > { %p1654_p13 = pneg %p1653_p12 }
  0x3c   : > { %p1659_p11 = pnand %p1658_p7, %p1654_p13 }
  0x3e   : > { %1662 = shalt.err (!%p1659_p11)
}
  0x3f   : > { %s2300_s8 = smov 8   ;;  %s2301_s27 = smov 128  }
  0x40   : > { %1414 = dma.hbm_to_vmem [thread:$0]  (!%p1972_p2), %s374_s12, 256, %s376_s11, %s364_s15, %s2301_s27, %s2301_s27, %s2300_s8  }
  0x41   : > { %s389_s28 = scalar_lea.vmem [#allocation5], %s1965_s29  ;;  %s385_s30 = sand.u32 1, %s1790_s16  }
  0x42   : > { %s397_s22 = sshll.u32 %s389_s28, 4  ;;  %s386_s6 = scalar_lea.sflag [#allocation6], %s385_s30  ;;  %s398_s22 = int_to_ptr.vmem [resolvable:$true] %s397_s22 }
  0x43   : > { %s1678_s21 = sshra.s32 %s396_s26, 4  ;;  %s1685_s0 = scalar_lea.hbm %s2262_s1, 32  ;;  %s1679_s21 = int_to_ptr.hbm [resolvable:$true] %s1678_s21 }
  0x44   : > { %s1680_s18 = scalar_lea.hbm %s1679_s21, 16  ;;  %p1686_p13 = scmp.lt.s32.totalorder %s1679_s21, %s2262_s1 }
  0x45   : > { %p1681_p9 = scmp.ne.s32.totalorder %s1679_s21, %s1680_s18  ;;  %p1687_p0 = scmp.lt.s32.totalorder %s1685_s0, %s1680_s18 }
  0x47   : > { %p1683_p11 = pnand %p1681_p9, %p1652_p10  ;;  %p1688_p5 = por %p1687_p0, %p1686_p13 }
  0x49   : > { %p1684_p12 = pneg %p1683_p11 }
  0x4b   : > { %p1689_p7 = pnand %p1688_p5, %p1684_p12 }
  0x4d   : > { %1692 = shalt.err (!%p1689_p7)
}
  0x4e   : > { %1417 = dma.hbm_to_vmem [thread:$0]  (!%p1972_p2), %s396_s26, 256, %s398_s22, %s386_s6, %s2301_s27, %s2301_s27, %s2300_s8  }
  0x4f   : > { %409 = sbr.rel (%p1903_p8) target bundleno = 1205 (0x4b5), region = 60  ;;  %s2014_s11 = sand.u32 (!%p1903_p8), 1, %s1782_s14  }
  0x50   : > { %s2017_s20 = sshll.u32 (!%p1903_p8), %s2014_s11, 4  ;;  %s412_s0 = scalar_lea.sflag (!%p1903_p8), [#allocation3], %s2014_s11 }
  0x51   : > { %s415_s12 = scalar_lea.vmem (!%p1903_p8), [#allocation2], %s2017_s20 }
  0x54   : > { %1753 = dma.done.wait (%p1890_p4), %s412_s0, 256  }
  0x55   : > { %1755 = vsyncadd (%p1890_p4), %s412_s0, 4294967040  ;;  %s421_s4 = sand.u32 1, %s1881_s17   ;;  %s425_s26 = scalar_lea.vmem [#allocation5], %s2017_s20 }
  0x56   : > { %s422_s24 = scalar_lea.sflag [#allocation6], %s421_s4 }
  0x57   : > { %1757 = dma.done.wait (%p1890_p4), %s422_s24, 256  }
  0x58   : > { %1759 = vsyncadd (%p1890_p4), %s422_s24, 4294967040 }
  0x59   : > { %1761 = dma.done.wait (%p52_p1), [#allocation6], 512  }
  0x5a   : > { %1763 = vsyncadd (%p52_p1), [#allocation6], 4294966784 }
  0x5b   : > { %1765 = dma.done.wait (%p52_p1), [#allocation9], 1024  }
  0x5c   : > { %1767 = vsyncadd (%p52_p1), [#allocation9], 4294966272 }
  0x5d   : > { %1769 = dma.done.wait (%p52_p1), [#allocation12], 512  }
  0x5e   : > { %1771 = vsyncadd (%p52_p1), [#allocation12], 4294966784  ;;  %v498_v0 = vld [vmem:[#allocation7 + $0x18] sm:$0xff]  ;;  %v497_v2 = vld [vmem:[#allocation7 + $0x10] sm:$0xff]  ;;  %vm503_vm0 = vcmask 261120   ;;  %s1798_s8 = smov 120  }
  0x5f   : > { %v536_v1 = vld [vmem:[#allocation8 + $0x18] sm:$0xff]  ;;  %522 = vmatpush.msra.mxu0 %v498_v0  ;;  %v535_v3 = vld [vmem:[#allocation8 + $0x10] sm:$0xff]  ;;  %v496_v4 = vld [vmem:[#allocation7 + $0x8] sm:$0xff]  ;;  %vm603_vm1 = vcmask 64512   ;;  %s1799_s22 = smov 112   ;;  %s1800_s30 = smov 104  }
  0x60   : > { %553 = vmatpush.msra.mxu1 %v536_v1  ;;  %v534_v5 = vld [vmem:[#allocation8 + $0x8] sm:$0xff]  ;;  %v495_v6 = vld [vmem:[#allocation7] sm:$0xff]  ;;  %vm639_vm2 = vcmask 130048   ;;  %v567_v36 = vld [vmem:[#allocation10 + $0x18] sm:$0xff]  ;;  %s1801_s18 = smov 8   ;;  %s1802_s23 = smov 16  }
  0x61   : > { %523 = vmatpush.msra.mxu0 %v497_v2  ;;  %v533_v7 = vld [vmem:[#allocation8] sm:$0xff]  ;;  %v494_v9 = vld [vmem:[%s425_s26 + $0x8] sm:$0xff]  ;;  %590 = vmatpush.msra.mxu2 %v567_v36  ;;  %v566_v37 = vld [vmem:[#allocation10 + $0x10] sm:$0xff]  ;;  %s1803_s25 = smov 24   ;;  %s487_s4 = scalar_lea.vmem [#allocation13], %s2017_s20 }
  0x62   : > { %554 = vmatpush.msra.mxu1 %v535_v3  ;;  %v493_v8 = vld [vmem:[%s425_s26] sm:$0xff]  ;;  %v565_v38 = vld [vmem:[#allocation10 + $0x8] sm:$0xff]  ;;  %s1178_s29 = sshll.u32 %s487_s4, 4  ;;  %s1166_s27 = scalar_lea.sflag [#allocation4], %s2014_s11  ;;  %s1179_s29 = int_to_ptr.vmem [resolvable:$true] %s1178_s29 }
  0x63   : > { %524 = vmatpush.msra.mxu0 %v496_v4  ;;  %v1492_v10 = vld [vmem:[%s2264_s3] ss:$0 sm:$0xff]  ;;  %591 = vmatpush.msra.mxu2 %v566_v37  ;;  %v2090_v41 = vld [vmem:[%s415_s12 + $0x8] sm:$0xff] }
  0x64   : > { %555 = vmatpush.msra.mxu1 %v534_v5  ;;  %v1493_v15 = vld [vmem:[%s2266_s5] ss:$0 sm:$0xff] }
  0x65   : > { %525 = vmatpush.msra.mxu0 %v495_v6  ;;  %592 = vmatpush.msra.mxu2 %v565_v38  ;;  %v564_v39 = vld [vmem:[#allocation10] sm:$0xff] }
  0x66   : > { %556 = vmatpush.msra.mxu1 %v533_v7  ;;  %1336 = vmatmul.msk.f32.vlgmr.msra.gmra.mxu0 %vm503_vm0, %v493_v8  ;;  %v2084_v40 = vld [vmem:[%s415_s12] sm:$0xff]  ;;  %s1375_s12 = sshll.u32 %s1881_s17, 4 }
  0x67   : > { %1338 = vmatmul.msk.f32.vlgmr.msra.gmra.mxu1 %vm503_vm0, %v493_v8  ;;  %593 = vmatpush.msra.mxu2 %v564_v39  ;;  %v1494_v62 = vld [vmem:[%s2268_s7] ss:$0 sm:$0xff]  ;;  %s1177_s19 = scalar_lea.hbm %s2271_s10, %s1375_s12 }
  0x68   : > { %1340 = vmatmul.msk.f32.vlgmr.msra.gmra.mxu2 %vm503_vm0, %v2084_v40 }
  0x6e   : > { %1337 = vmatmul.msk.f32.gmra.mxu0 %vm503_vm0, %v494_v9 }
  0x6f   : > { %1339 = vmatmul.msk.f32.gmra.mxu1 %vm503_vm0, %v494_v9 }
  0x70   : > { %1341 = vmatmul.msk.f32.gmra.mxu2 %vm503_vm0, %v2090_v41 }
  0xe3   : > { %v527_v11 = vpop.f32.mrf.mxu0 }
  0xe4   : > { %v558_v12 = vpop.f32.mrf.mxu1  ;;  %v528_v13 = vadd.f32 %v1492_v10, %v527_v11 }
  0xe5   : > { %v559_v21 = vadd.f32 %v1493_v15, %v558_v12 }
  0xe6   : > { %v601_v14 = vmul.f32 0.35355338, %v528_v13 }
  0xe8   : > { %719 = vrot.lane.b32.xlu1 %v601_v14, %s1798_s8 }
  0xeb   : > { %v530_v16 = vpop.f32.mrf.mxu0  ;;  %v595_v61 = vpop.f32.mrf.mxu2 }
  0xec   : > { %v561_v17 = vpop.f32.mrf.mxu1  ;;  %v531_v18 = vadd.f32 %v1492_v10, %v530_v16  ;;  %v596_v4 = vadd.f32 %v1494_v62, %v595_v61 }
  0xed   : > { %v562_v19 = vadd.f32 %v1493_v15, %v561_v17 }
  0xee   : > { %v602_v20 = vmul.f32 0.35355338, %v531_v18 }
  0xef   : > { %851 = vrot.lane.b32.xlu2 %v562_v19, %s1799_s22  ;;  %725 = vrot.lane.b32.xlu0 %v562_v19, %s1798_s8 }
  0xf0   : > { %1342 = vmatpush.xpose.msk.msra.mxu3 %vm603_vm1, %v562_v19  ;;  %721 = vrot.lane.b32.xlu1 %v602_v20, %s1798_s8 }
  0xf3   : > { %v598_v63 = vpop.f32.mrf.mxu2 }
  0xf4   : > { %1343 = vmatpush.xpose.msk.msra.mxu3 %vm603_vm1, %v559_v21  ;;  %v599_v2 = vadd.f32 %v1494_v62, %v598_v63 }
  0xf6   : > { %710 = vmatpush.msrb.mxu0 %v599_v2  ;;  %v1487_v15 = vpack.i.bf16 %v596_v4, %v599_v2 }
  0xf7   : > { %1344 = vmatmul.msk.f32.vlgmr.msra.gmra.mxu3 %vm603_vm1, %v601_v14  ;;  %975 = vrot.lane.b32.xlu2 %v562_v19, %s1800_s30 }
  0xf8   : > { %723 = vrot.lane.b32.xlu0 %v559_v21, %s1798_s8  ;;  %973 = vrot.lane.b32.xlu1 %v559_v21, %s1800_s30 }
  0xf9   : > { %711 = vmatpush.msrb.mxu0 %v596_v4 }
  0xff   : > { %845 = vrot.lane.b32.xlu2 %v601_v14, %s1799_s22  ;;  %1345 = vmatmul.msk.f32.gmra.mxu3 %vm603_vm1, %v602_v20 }
 0x100   : > { %849 = vrot.lane.b32.xlu0 %v559_v21, %s1799_s22  ;;  %847 = vrot.lane.b32.xlu1 %v602_v20, %s1799_s22 }
 0x107   : > { %971 = vrot.lane.b32.xlu2 %v602_v20, %s1800_s30 }
 0x108   : > { %969 = vrot.lane.b32.xlu0 %v601_v14, %s1800_s30 }
 0x149   : > { %v852_v22 = vpop.permute.xlu2 %851 }
 0x14a   : > { %1354 = vmatpush.xpose.msk.msrb.mxu3 %vm603_vm1, %v852_v22 }
 0x151   : > { %v976_v27 = vpop.permute.xlu2 %975 }
 0x159   : > { %v846_v30 = vpop.permute.xlu2 %845 }
 0x15a   : > { %v720_v23 = vpop.permute.xlu1 %719 }
 0x161   : > { %v726_v24 = vpop.permute.xlu0 %725  ;;  %v972_v35 = vpop.permute.xlu2 %971 }
 0x162   : > { %1348 = vmatpush.xpose.msk.msrb.mxu1 %vm603_vm1, %v726_v24  ;;  %v722_v25 = vpop.permute.xlu1 %721 }
 0x16a   : > { %v724_v26 = vpop.permute.xlu0 %723  ;;  %v974_v28 = vpop.permute.xlu1 %973 }
 0x16b   : > { %1349 = vmatpush.xpose.msk.msrb.mxu1 %vm603_vm1, %v724_v26 }
 0x16e   : > { %1350 = vmatmul.msk.f32.vlgmr.msrb.gmra.mxu1 %vm603_vm1, %v720_v23 }
 0x16f   : > { %1360 = vmatpush.xpose.msk.msra.mxu1 %vm603_vm1, %v976_v27 }
 0x172   : > { %v850_v29 = vpop.permute.xlu0 %849  ;;  %v848_v33 = vpop.permute.xlu1 %847 }
 0x173   : > { %1361 = vmatpush.xpose.msk.msra.mxu1 %vm603_vm1, %v974_v28  ;;  %1355 = vmatpush.xpose.msk.msrb.mxu3 %vm603_vm1, %v850_v29 }
 0x176   : > { %1351 = vmatmul.msk.f32.gmra.mxu1 %vm603_vm1, %v722_v25  ;;  %1356 = vmatmul.msk.f32.vlgmr.msrb.gmra.mxu3 %vm603_vm1, %v846_v30 }
 0x17a   : > { %v633_v31 = vpop.f32.mrf.mxu3  ;;  %v970_v34 = vpop.permute.xlu0 %969 }
 0x17b   : > { %v640_v32 = vsel %vm639_vm2, %v633_v31, -inf }
 0x17c   : > { %641 = vmax.xlane.f32.xlu1 %v640_v32 }
 0x17e   : > { %1357 = vmatmul.msk.f32.gmra.mxu3 %vm603_vm1, %v848_v33  ;;  %1362 = vmatmul.msk.f32.vlgmr.msra.gmra.mxu1 %vm603_vm1, %v970_v34 }
 0x182   : > { %v636_v44 = vpop.f32.mrf.mxu3 }
 0x183   : > { %v643_v53 = vsel %vm639_vm2, %v636_v44, -inf }
 0x186   : > { %1363 = vmatmul.msk.f32.gmra.mxu1 %vm603_vm1, %v972_v35 }
 0x1eb   : > { %v752_v42 = vpop.f32.mrf.mxu1 }
 0x1ec   : > { %v758_v43 = vsel %vm639_vm2, %v752_v42, -inf }
 0x1ed   : > { %759 = vmax.xlane.f32.xlu0 %v758_v43 }
 0x1ef   : > { %v642_v47 = vpop.xlane.xlu1 %641 }
 0x1f0   : > { %v646_v50 = vsub.f32 %v633_v31, %v642_v47 }
 0x1f2   : > { %v648_v54 = vmul.f32 1.442695, %v646_v50 }
 0x1f3   : > { %v755_v45 = vpop.f32.mrf.mxu1 }
 0x1f4   : > { %v761_v46 = vsel %vm639_vm2, %v755_v45, -inf  ;;  %1496 = vpow2.f32 %v648_v54 }
 0x1f5   : > { %762 = vmax.xlane.f32.xlu2 %v761_v46 }
 0x1f9   : > { %v878_v48 = vpop.f32.mrf.mxu3 }
 0x1fa   : > { %v884_v49 = vsel %vm639_vm2, %v878_v48, -inf  ;;  %v2101_v59 = vpop.eup %1496 }
 0x1fb   : > { %v1002_v51 = vpop.f32.mrf.mxu1  ;;  %885 = vmax.xlane.f32.xlu1 %v884_v49  ;;  %v652_v60 = vsel %vm639_vm2, %v2101_v59, 0.0 }
 0x1fc   : > { %v1008_v52 = vsel %vm639_vm2, %v1002_v51, -inf }
 0x1fd   : > { %1009 = vmax.xlane.f32.xlu0 %v1008_v52  ;;  %644 = vmax.xlane.f32.xlu2 %v643_v53 }
 0x201   : > { %v881_v55 = vpop.f32.mrf.mxu3 }
 0x202   : > { %v887_v57 = vsel %vm639_vm2, %v881_v55, -inf }
 0x203   : > { %v1005_v56 = vpop.f32.mrf.mxu1 }
 0x204   : > { %v1011_v58 = vsel %vm639_vm2, %v1005_v56, -inf }
 0x205   : > { %888 = vmax.xlane.f32.xlu0 %v887_v57  ;;  %1012 = vmax.xlane.f32.xlu2 %v1011_v58 }
 0x20d   : > { %653 = vadd.xlane.f32.xlu2 %v652_v60 }
 0x260   : > { %v760_v0 = vpop.xlane.xlu0 %759 }
 0x261   : > { %v764_v13 = vsub.f32 %v752_v42, %v760_v0 }
 0x263   : > { %v766_v16 = vmul.f32 1.442695, %v764_v13 }
 0x268   : > { %v763_v1 = vpop.xlane.xlu2 %762 }
 0x269   : > { %v765_v3 = vsub.f32 %v755_v45, %v763_v1 }
 0x26b   : > { %v768_v5 = vmul.f32 1.442695, %v765_v3 }
 0x26d   : > { %1498 = vpow2.f32 %v768_v5 }
 0x26e   : > { %v886_v18 = vpop.xlane.xlu1 %885 }
 0x26f   : > { %v890_v23 = vsub.f32 %v878_v48, %v886_v18 }
 0x270   : > { %v1010_v6 = vpop.xlane.xlu0 %1009  ;;  %v645_v7 = vpop.xlane.xlu2 %644 }
 0x271   : > { %v1014_v8 = vsub.f32 %v1002_v51, %v1010_v6  ;;  %v647_v9 = vsub.f32 %v636_v44, %v645_v7  ;;  %v892_v26 = vmul.f32 1.442695, %v890_v23 }
 0x273   : > { %v2108_v10 = vpop.eup %1498  ;;  %v1016_v11 = vmul.f32 1.442695, %v1014_v8  ;;  %v650_v12 = vmul.f32 1.442695, %v647_v9 }
 0x274   : > { %v773_v14 = vsel %vm639_vm2, %v2108_v10, 0.0 }
 0x275   : > { %1500 = vpow2.f32 %v1016_v11  ;;  %774 = vadd.xlane.f32.xlu0 %v773_v14 }
 0x276   : > { %1502 = vpow2.f32 %v650_v12 }
 0x277   : > { %1504 = vpow2.f32 %v766_v16 }
 0x278   : > { %v1013_v17 = vpop.xlane.xlu2 %1012  ;;  %v889_v28 = vpop.xlane.xlu0 %888 }
 0x279   : > { %v1015_v19 = vsub.f32 %v1005_v56, %v1013_v17  ;;  %v891_v32 = vsub.f32 %v881_v55, %v889_v28 }
 0x27b   : > { %v2112_v20 = vpop.eup %1500  ;;  %v1018_v21 = vmul.f32 1.442695, %v1015_v19  ;;  %v894_v35 = vmul.f32 1.442695, %v891_v32 }
 0x27c   : > { %v2114_v22 = vpop.eup %1502  ;;  %v1020_v24 = vsel %vm639_vm2, %v2112_v20, 0.0 }
 0x27d   : > { %1021 = vadd.xlane.f32.xlu2 %v1020_v24  ;;  %v655_v25 = vsel %vm639_vm2, %v2114_v22, 0.0  ;;  %1506 = vpow2.f32 %v1018_v21  ;;  %v2120_v30 = vpop.eup %1504 }
 0x27e   : > { %656 = vadd.xlane.f32.xlu1 %v655_v25  ;;  %v770_v33 = vsel %vm639_vm2, %v2120_v30, 0.0 }
 0x280   : > { %v654_v27 = vpop.xlane.xlu2 %653 }
 0x281   : > { %v658_v29 = vadd.f32 1.0, %v654_v27 }
 0x283   : > { %1508 = vrcp.f32 %v658_v29  ;;  %v2122_v31 = vpop.eup %1506  ;;  %v671_v42 = vand.u32 2147483648, %v658_v29  ;;  %v669_v45 = vand.u32 2147483647, %v658_v29  ;;  %vm665_vm4 = vweird.f32 %v658_v29 }
 0x284   : > { %1510 = vpow2.f32 %v892_v26  ;;  %v1023_v34 = vsel %vm639_vm2, %v2122_v31, 0.0 }
 0x285   : > { %1024 = vadd.xlane.f32.xlu2 %v1023_v34  ;;  %1512 = vpow2.f32 %v894_v35  ;;  %v672_v47 = vor.u32 1.1754944e-38, %v671_v42  ;;  %vm670_vm6 = vcmp.eq.f32.partialorder %v669_v45, 8.507059e+37 }
 0x286   : > { %771 = vadd.xlane.f32.xlu1 %v770_v33 }
 0x289   : > { %v1509_v36 = vpop.eup %1508  ;;  %1478 = vrot.lane.b32.xlu0 %v1487_v15, %s1798_s8  ;;  %s1180_s8 = sshll.u32 %s1177_s19, 4  ;;  %s1181_s8 = int_to_ptr.hbm [resolvable:$true] %s1180_s8 }
 0x28a   : > { %v2129_v37 = vpop.eup %1510  ;;  %v661_v38 = vmul.f32 %v1509_v36, %v658_v29  ;;  %vm666_vm3 = vweird.f32 %v1509_v36  ;;  %s1722_s28 = sshra.s32 %s1181_s8, 4  ;;  %s1723_s28 = int_to_ptr.hbm [resolvable:$true] %s1722_s28 }
 0x28b   : > { %v896_v43 = vsel %vm639_vm2, %v2129_v37, 0.0  ;;  %vm667_vm5 = vmor %vm665_vm4, %vm666_vm3  ;;  %v2133_v48 = vpop.eup %1512  ;;  %s1724_s17 = scalar_lea.hbm %s1723_s28, 16  ;;  %p1729_p2 = scmp.lt.s32.totalorder %s1723_s28, %s2271_s10 }
 0x28c   : > { %v662_v39 = vsub.f32 1.0, %v661_v38  ;;  %v899_v52 = vsel %vm639_vm2, %v2133_v48, 0.0  ;;  %p1725_p1 = scmp.ne.s32.totalorder %s1723_s28, %s1724_s17 }
 0x28e   : > { %v663_v44 = vmul.f32 %v1509_v36, %v662_v39  ;;  %897 = vadd.xlane.f32.xlu1 %v896_v43  ;;  %p1726_p4 = pnand %p1725_p1, %p1956_p3 }
 0x290   : > { %v664_v46 = vadd.f32 %v1509_v36, %v663_v44  ;;  %p1727_p8 = pneg %p1726_p4 }
 0x292   : > { %v668_v49 = vsel %vm667_vm5, %v1509_v36, %v664_v46 }
 0x293   : > { %v673_v50 = vsel %vm670_vm6, %v672_v47, %v668_v49 }
 0x294   : > { %v674_v51 = vmul.f32 %v2101_v59, %v673_v50 }
 0x296   : > { %900 = vadd.xlane.f32.xlu1 %v899_v52  ;;  %1346 = vmatmul.msk.f32.vlgmr.msrb.gmra.mxu0 %vm639_vm2, %v674_v51 }
 0x29d   : > { %1483 = vrot.lane.b32.xlu2 %v1487_v15, %s1800_s30  ;;  %s1728_s30 = scalar_lea.hbm %s2271_s10, 32 }
 0x29e   : > { %p1730_p10 = scmp.lt.s32.totalorder %s1728_s30, %s1724_s17 }
 0x2a0   : > { %p1731_p9 = por %p1730_p10, %p1729_p2 }
 0x2a2   : > { %p1732_p11 = pnand %p1731_p9, %p1727_p8 }
 0x2af   : > { %1488 = vrot.lane.b32.xlu1 %v1487_v15, %s1799_s22 }
 0x2e8   : > { %v775_v53 = vpop.xlane.xlu0 %774 }
 0x2e9   : > { %v2141_v55 = vadd.f32 1.0, %v775_v53 }
 0x2eb   : > { %v804_v47 = vand.u32 2147483648, %v2141_v55  ;;  %vm798_vm3 = vweird.f32 %v2141_v55  ;;  %v802_v50 = vand.u32 2147483647, %v2141_v55 }
 0x2ed   : > { %vm803_vm5 = vcmp.eq.f32.partialorder %v802_v50, 8.507059e+37 }
 0x2f0   : > { %v1022_v54 = vpop.xlane.xlu2 %1021 }
 0x2f1   : > { %v657_v56 = vpop.xlane.xlu1 %656  ;;  %v2144_v61 = vadd.f32 1.0, %v1022_v54 }
 0x2f2   : > { %v659_v57 = vadd.f32 1.0, %v657_v56  ;;  %v805_v56 = vor.u32 1.1754944e-38, %v804_v47 }
 0x2f4   : > { %1514 = vrcp.f32 %v659_v57  ;;  %v686_v7 = vand.u32 2147483648, %v659_v57  ;;  %v684_v8 = vand.u32 2147483647, %v659_v57  ;;  %vm680_vm8 = vweird.f32 %v659_v57 }
 0x2f5   : > { %1516 = vrcp.f32 %v2141_v55 }
 0x2f6   : > { %v687_v21 = vor.u32 1.1754944e-38, %v686_v7  ;;  %vm685_vm10 = vcmp.eq.f32.partialorder %v684_v8, 8.507059e+37 }
 0x2f8   : > { %v1025_v59 = vpop.xlane.xlu2 %1024 }
 0x2f9   : > { %v772_v58 = vpop.xlane.xlu1 %771  ;;  %v2151_v9 = vadd.f32 1.0, %v1025_v59 }
 0x2fa   : > { %v1515_v60 = vpop.eup %1514  ;;  %v776_v62 = vadd.f32 1.0, %v772_v58 }
 0x2fb   : > { %v2146_v63 = vpop.eup %1516  ;;  %v676_v0 = vmul.f32 %v1515_v60, %v659_v57  ;;  %v1479_v1 = vpop.permute.xlu0 %1478  ;;  %vm681_vm7 = vweird.f32 %v1515_v60  ;;  %v1054_v8 = vand.u32 2147483648, %v2151_v9 }
 0x2fc   : > { %1518 = vrcp.f32 %v776_v62  ;;  %v1480_v3 = vunpack.i.l.bf16 %v1479_v1  ;;  %v1481_v4 = vunpack.i.h.bf16 %v1479_v1  ;;  %v794_v5 = vmul.f32 %v2146_v63, %v2141_v55  ;;  %vm682_vm9 = vmor %vm680_vm8, %vm681_vm7 }
 0x2fd   : > { %v677_v2 = vsub.f32 1.0, %v676_v0  ;;  %1520 = vrcp.f32 %v2144_v61  ;;  %v789_v27 = vand.u32 2147483648, %v776_v62  ;;  %v787_v34 = vand.u32 2147483647, %v776_v62 }
 0x2fe   : > { %836 = vmatpush.msrb.mxu2 %v1480_v3  ;;  %v795_v15 = vsub.f32 1.0, %v794_v5  ;;  %1522 = vrcp.f32 %v2151_v9  ;;  %vm783_vm12 = vweird.f32 %v776_v62  ;;  %vm799_vm14 = vweird.f32 %v2146_v63 }
 0x2ff   : > { %v678_v6 = vmul.f32 %v1515_v60, %v677_v2  ;;  %v790_v39 = vor.u32 1.1754944e-38, %v789_v27  ;;  %vm788_vm15 = vcmp.eq.f32.partialorder %v787_v34, 8.507059e+37  ;;  %vm800_vm4 = vmor %vm798_vm3, %vm799_vm14  ;;  %vm1033_vm7 = vweird.f32 %v2144_v61 }
 0x300   : > { %v1484_v12 = vpop.permute.xlu2 %1483  ;;  %837 = vmatpush.msrb.mxu2 %v1481_v4  ;;  %v796_v29 = vmul.f32 %v2146_v63, %v795_v15 }
 0x301   : > { %v898_v11 = vpop.xlane.xlu1 %897  ;;  %v679_v13 = vadd.f32 %v1515_v60, %v678_v6  ;;  %v1485_v17 = vunpack.i.l.bf16 %v1484_v12  ;;  %v1486_v24 = vunpack.i.h.bf16 %v1484_v12 }
 0x302   : > { %v1519_v14 = vpop.eup %1518  ;;  %v2153_v16 = vadd.f32 1.0, %v898_v11  ;;  %v797_v44 = vadd.f32 %v2146_v63, %v796_v29 }
 0x303   : > { %v779_v18 = vmul.f32 %v1519_v14, %v776_v62  ;;  %v683_v19 = vsel %vm682_vm9, %v1515_v60, %v679_v13  ;;  %v2155_v23 = vpop.eup %1520  ;;  %1084 = vmatpush.msra.mxu2 %v1485_v17  ;;  %vm784_vm11 = vweird.f32 %v1519_v14  ;;  %v1039_v60 = vand.u32 2147483648, %v2144_v61 }
 0x304   : > { %v688_v26 = vsel %vm685_vm10, %v687_v21, %v683_v19  ;;  %1524 = vrcp.f32 %v2153_v16  ;;  %v1029_v32 = vmul.f32 %v2155_v23, %v2144_v61  ;;  %vm785_vm13 = vmor %vm783_vm12, %vm784_vm11  ;;  %v801_v54 = vsel %vm800_vm4, %v2146_v63, %v797_v44  ;;  %v1127_v44 = vld [vmem:[#allocation11 + $0x8] sm:$0xff] }
 0x305   : > { %v780_v25 = vsub.f32 1.0, %v779_v18  ;;  %1085 = vmatpush.msra.mxu2 %v1486_v24  ;;  %v689_v28 = vmul.f32 %v2114_v22, %v688_v26  ;;  %v2167_v22 = vpop.eup %1522  ;;  %vm1034_vm6 = vweird.f32 %v2155_v23  ;;  %v1037_v62 = vand.u32 2147483647, %v2144_v61 }
 0x306   : > { %v1030_v42 = vsub.f32 1.0, %v1029_v32  ;;  %v1044_v52 = vmul.f32 %v2167_v22, %v2151_v9  ;;  %vm1035_vm8 = vmor %vm1033_vm7, %vm1034_vm6  ;;  %v1040_v4 = vor.u32 1.1754944e-38, %v1039_v60  ;;  %vm1049_vm10 = vweird.f32 %v2167_v22  ;;  %v1495_v60 = vld [vmem:[%s2270_s9] ss:$0 sm:$0xff] }
 0x307   : > { %v781_v33 = vmul.f32 %v1519_v14, %v780_v25  ;;  %1347 = vmatmul.msk.f32.gmra.mxu0 %vm639_vm2, %v689_v28  ;;  %vm1038_vm9 = vcmp.eq.f32.partialorder %v1037_v62, 8.507059e+37  ;;  %v915_v7 = vand.u32 2147483648, %v2153_v16  ;;  %vm1048_vm12 = vweird.f32 %v2151_v9 }
 0x308   : > { %v1031_v51 = vmul.f32 %v2155_v23, %v1030_v42  ;;  %v1045_v55 = vsub.f32 1.0, %v1044_v52  ;;  %v913_v11 = vand.u32 2147483647, %v2153_v16  ;;  %vm1050_vm14 = vmor %vm1048_vm12, %vm1049_vm10  ;;  %v1052_v13 = vand.u32 2147483647, %v2151_v9  ;;  %v1129_v42 = vld [vmem:[#allocation11 + $0x18] sm:$0xff] }
 0x309   : > { %v901_v35 = vpop.xlane.xlu1 %900  ;;  %v782_v36 = vadd.f32 %v1519_v14, %v781_v33  ;;  %v916_v18 = vor.u32 1.1754944e-38, %v915_v7  ;;  %v1055_v19 = vor.u32 1.1754944e-38, %v1054_v8  ;;  %1152 = vmatpush.msra.mxu3 %v1129_v42 }
 0x30a   : > { %v2164_v38 = vadd.f32 1.0, %v901_v35  ;;  %v1525_v45 = vpop.eup %1524  ;;  %v1032_v57 = vadd.f32 %v2155_v23, %v1031_v51  ;;  %v1046_v3 = vmul.f32 %v2167_v22, %v1045_v55  ;;  %vm914_vm3 = vcmp.eq.f32.partialorder %v913_v11, 8.507059e+37 }
 0x30b   : > { %v786_v43 = vsel %vm785_vm13, %v1519_v14, %v782_v36  ;;  %v905_v53 = vmul.f32 %v1525_v45, %v2153_v16  ;;  %vm910_vm11 = vweird.f32 %v1525_v45  ;;  %vm909_vm13 = vweird.f32 %v2153_v16 }
 0x30c   : > { %v791_v46 = vsel %vm788_vm15, %v790_v39, %v786_v43  ;;  %1526 = vrcp.f32 %v2164_v38  ;;  %v1036_v2 = vsel %vm1035_vm8, %v2155_v23, %v1032_v57  ;;  %vm911_vm15 = vmor %vm909_vm13, %vm910_vm11  ;;  %vm1053_vm4 = vcmp.eq.f32.partialorder %v1052_v13, 8.507059e+37  ;;  %v1128_v43 = vld [vmem:[#allocation11 + $0x10] sm:$0xff] }
 0x30d   : > { %v792_v49 = vmul.f32 %v2120_v30, %v791_v46  ;;  %v806_v30 = vsel %vm803_vm5, %v805_v56, %v801_v54  ;;  %v906_v58 = vsub.f32 1.0, %v905_v53  ;;  %v1041_v5 = vsel %vm1038_vm9, %v1040_v4, %v1036_v2  ;;  %1153 = vmatpush.msra.mxu3 %v1128_v43 }
 0x30e   : > { %v807_v0 = vmul.f32 %v2108_v10, %v806_v30  ;;  %v1047_v10 = vadd.f32 %v2167_v22, %v1046_v3  ;;  %v1042_v12 = vmul.f32 %v2112_v20, %v1041_v5  ;;  %v930_v9 = vand.u32 2147483648, %v2164_v38 }
 0x30f   : > { %1352 = vmatmul.msk.f32.vlgmr.msrb.gmra.mxu2 %vm639_vm2, %v792_v49  ;;  %v907_v63 = vmul.f32 %v1525_v45, %v906_v58  ;;  %vm924_vm6 = vweird.f32 %v2164_v38  ;;  %v928_v28 = vand.u32 2147483647, %v2164_v38  ;;  %1154 = vmatpush.msra.mxu3 %v1127_v44  ;;  %vm1121_vm9 = vcmask 195584  }
 0x310   : > { %v1051_v15 = vsel %vm1050_vm14, %v2167_v22, %v1047_v10  ;;  %v931_v32 = vor.u32 1.1754944e-38, %v930_v9 }
 0x311   : > { %v908_v6 = vadd.f32 %v1525_v45, %v907_v63  ;;  %v1056_v16 = vsel %vm1053_vm4, %v1055_v19, %v1051_v15  ;;  %vm929_vm8 = vcmp.eq.f32.partialorder %v928_v28, 8.507059e+37 }
 0x312   : > { %v1527_v59 = vpop.eup %1526  ;;  %v1057_v27 = vmul.f32 %v2122_v31, %v1056_v16 }
 0x313   : > { %v920_v1 = vmul.f32 %v1527_v59, %v2164_v38  ;;  %v912_v14 = vsel %vm911_vm15, %v1525_v45, %v908_v6  ;;  %vm925_vm5 = vweird.f32 %v1527_v59  ;;  %v713_v31 = vpop.f32.mrf.mxu0  ;;  %v1126_v45 = vld [vmem:[#allocation11] sm:$0xff] }
 0x314   : > { %v917_v24 = vsel %vm914_vm3, %v916_v18, %v912_v14  ;;  %vm926_vm7 = vmor %vm924_vm6, %vm925_vm5  ;;  %1155 = vmatpush.msra.mxu3 %v1126_v45 }
 0x315   : > { %v921_v61 = vsub.f32 1.0, %v920_v1  ;;  %v918_v26 = vmul.f32 %v2129_v37, %v917_v24 }
 0x317   : > { %1353 = vmatmul.msk.f32.gmra.mxu2 %vm639_vm2, %v807_v0  ;;  %v922_v17 = vmul.f32 %v1527_v59, %v921_v61 }
 0x319   : > { %v923_v25 = vadd.f32 %v1527_v59, %v922_v17 }
 0x31b   : > { %v927_v29 = vsel %vm926_vm7, %v1527_v59, %v923_v25 }
 0x31c   : > { %v932_v33 = vsel %vm929_vm8, %v931_v32, %v927_v29 }
 0x31d   : > { %v933_v34 = vmul.f32 %v2133_v48, %v932_v33 }
 0x31f   : > { %1364 = vmatmul.msk.f32.vlgmr.msra.gmra.mxu2 %vm639_vm2, %v1042_v12 }
 0x321   : > { %v1489_v21 = vpop.permute.xlu1 %1488 }
 0x322   : > { %v1490_v23 = vunpack.i.l.bf16 %v1489_v21  ;;  %v1491_v20 = vunpack.i.h.bf16 %v1489_v21 }
 0x324   : > { %960 = vmatpush.msra.mxu0 %v1490_v23 }
 0x326   : > { %961 = vmatpush.msra.mxu0 %v1491_v20 }
 0x327   : > { %1358 = vmatmul.msk.f32.vlgmr.msra.gmra.mxu0 %vm639_vm2, %v918_v26  ;;  %1365 = vmatmul.msk.f32.gmra.mxu2 %vm639_vm2, %v1057_v27 }
 0x32f   : > { %1359 = vmatmul.msk.f32.gmra.mxu0 %vm639_vm2, %v933_v34 }
 0x384   : > { %v716_v36 = vpop.f32.mrf.mxu0 }
 0x392   : > { %v839_v37 = vpop.f32.mrf.mxu2 }
 0x393   : > { %1095 = vrot.lane.b32.xlu0 %v839_v37, %s1801_s18 }
 0x39a   : > { %v842_v35 = vpop.f32.mrf.mxu2 }
 0x39b   : > { %1097 = vrot.lane.b32.xlu2 %v842_v35, %s1801_s18 }
 0x3a2   : > { %v1087_v39 = vpop.f32.mrf.mxu2 }
 0x3a4   : > { %v963_v38 = vpop.f32.mrf.mxu0 }
 0x3a5   : > { %1103 = vrot.lane.b32.xlu0 %v963_v38, %s1802_s23 }
 0x3aa   : > { %v1090_v48 = vpop.f32.mrf.mxu2 }
 0x3ac   : > { %v966_v22 = vpop.f32.mrf.mxu0 }
 0x3ad   : > { %1111 = vrot.lane.b32.xlu0 %v1087_v39, %s1803_s25  ;;  %1105 = vrot.lane.b32.xlu1 %v966_v22, %s1802_s23 }
 0x3b5   : > { %1113 = vrot.lane.b32.xlu0 %v1090_v48, %s1803_s25 }
 0x3f5   : > { %v1098_v54 = vpop.permute.xlu2 %1097 }
 0x3f6   : > { %v1118_v30 = vsel %vm603_vm1, %v716_v36, %v1098_v54 }
 0x405   : > { %v1096_v46 = vpop.permute.xlu0 %1095 }
 0x406   : > { %v1117_v49 = vsel %vm603_vm1, %v713_v31, %v1096_v46 }
 0x417   : > { %v1104_v47 = vpop.permute.xlu0 %1103 }
 0x418   : > { %v1119_v50 = vsel %vm639_vm2, %v1117_v49, %v1104_v47 }
 0x41f   : > { %v1112_v51 = vpop.permute.xlu0 %1111  ;;  %v1106_v56 = vpop.permute.xlu1 %1105 }
 0x420   : > { %v1122_v52 = vsel %vm1121_vm9, %v1119_v50, %v1112_v51  ;;  %v1120_v57 = vsel %vm639_vm2, %v1118_v30, %v1106_v56 }
 0x421   : > { %v1124_v53 = vadd.f32 %v1122_v52, %v2084_v40 }
 0x423   : > { %1366 = vmatmul.msk.f32.vlgmr.msra.gmra.mxu3 %vm503_vm0, %v1124_v53 }
 0x427   : > { %v1114_v55 = vpop.permute.xlu0 %1113 }
 0x428   : > { %v1123_v58 = vsel %vm1121_vm9, %v1120_v57, %v1114_v55 }
 0x429   : > { %v1125_v59 = vadd.f32 %v1123_v58, %v2090_v41 }
 0x42b   : > { %1367 = vmatmul.msk.f32.gmra.mxu3 %vm503_vm0, %v1125_v59 }
 0x4a6   : > { %v1157_v40 = vpop.f32.mrf.mxu3 }
 0x4a7   : > { %v1158_v62 = vadd.f32 %v1495_v60, %v1157_v40 }
 0x4a9   : > { %1163 = vst.msk [vmem:[%s487_s4] sm:$0xff] %vm503_vm0, %v1158_v62 }
 0x4ae   : > { %v1160_v41 = vpop.f32.mrf.mxu3 }
 0x4af   : > { %v1161_v0 = vadd.f32 %v1495_v60, %v1160_v41 }
 0x4b1   : > { %1164 = vst.msk [vmem:[%s487_s4 + $0x8] sm:$0xff] %vm503_vm0, %v1161_v0 }
 0x4b2   : > { %1735 = shalt.err (!%p1732_p11)
}
 0x4b3   : > { %s1804_s11 = smov 128  }
 0x4b4   : > { %1396 = dma.vmem_to_hbm [thread:$0]  (%p1956_p3), %s1179_s29, 256, %s1181_s8, %s1166_s27, %s1804_s11, %s1804_s11, %s1801_s18  }
 0x4b5 PF: > { %s1195_s25 = sand.u32 1, %s1778_s13   ;;  %p2303_p12 = scmp.ge.s32.totalorder %s1790_s16, 2 }
 0x4b6   : > { %s1196_s15 = scalar_lea.sflag [#allocation4], %s1195_s25 }
 0x4b7   : > { %p1419_p13 = pnand %p2303_p12, %p1895_p6 }
 0x4b9   : > { %p1420_p0 = pneg %p1419_p13 }
 0x4bb   : > { %1773 = dma.done.wait (%p1420_p0), %s1196_s15, 256  }
 0x4bc   : > { %1775 = vsyncadd (%p1420_p0), %s1196_s15, 4294967040  ;;  %s2304_s16 = sld [smem:[#allocation22_spill]]  ;;  %s2307_s13 = smov %s1782_s14 }
 0x4bd   : > { %s2305_s0 = sld [smem:[#allocation20_spill]] }
 0x4be   : > { %s2306_s15 = sld [smem:[#allocation23_spill]] }
 0x4c2   : > { %p28_p5 = scmp.ge.s32.totalorder %s2304_s16, 4  }
 0x4c3   : > { %s2308_s14 = smov %s2305_s0 }
 0x4c4   :  { %30 = sbr.rel (!%p28_p5) target bundleno = 15 (0xf), region = 134 }
 0x4c9   :  { %1202 = vsyncpa [#allocation3], 1 }
 0x4ca   :  { %1204 = vsyncpa [#allocation3 + $0x1], 1 }
 0x4cb   :  { %1205 = vsyncpa [#allocation6], 1 }
 0x4cc   :  { %1207 = vsyncpa [#allocation6 + $0x1], 1 }
 0x4cd   :  { %1208 = vsyncpa [#allocation9], 1 }
 0x4ce   :  { %1209 = vsyncpa [#allocation12], 1 }
 0x4cf   :  { %1210 = vsyncpa [#allocation4], 1 }
 0x4d0   :  { %1212 = vsyncpa [#allocation4 + $0x1], 1 }

</bundles_post_ra>
